<compile_context>
chip_gen: v5e
topology: v5e:2x2
jax: 0.10.0
libtpu: 0.0.40
codegen_flags: <defaults>
</compile_context>

<pallas_src>
import functools

import jax
import jax.numpy as jnp
from jax.experimental import pallas as pl
from jax.experimental.pallas import tpu as pltpu

LANES = 128


def _mse_partial_kernel(x_ref, t_ref, o_ref, *, last_block_rows):
    """Partial sum of (x - t)^2 for one (block_rows, 128) tile.

    Writes a lane-dense (1, 8, 128) partial (or (1, 1, 128) for tiny inputs);
    the wrapper does the final tiny reduction.

    last_block_rows (static): 0  => every block is full, no mask anywhere;
                              >0 => number of valid rows in the final block.
    """
    block_rows = x_ref.shape[0]

    def emit(masked):
        d = x_ref[...].astype(jnp.float32) - t_ref[...].astype(jnp.float32)
        sq = d * d
        if masked:
            # Only the ragged last block pays for this (sublane-index mask;
            # no flat-index math -> no int32 overflow for huge tensors).
            row = jax.lax.broadcasted_iota(jnp.int32, sq.shape, 0)
            sq = jnp.where(row < last_block_rows, sq, 0.0)
        if block_rows % 8 == 0:
            # Sum over the leading (non-tiled) dim: pure VPU vreg adds, no XLU
            # cross-sublane reduce; leaves an unmasked-store-friendly (8,128).
            o_ref[...] = jnp.sum(
                sq.reshape(block_rows // 8, 8, LANES), axis=0, keepdims=True)
        else:
            # Tiny-input fallback (rows < 8 => single block, full-dim output).
            o_ref[...] = jnp.sum(sq, axis=0, keepdims=True)[None]

    if last_block_rows == 0:
        # Static fast path: no mask code emitted at all.
        emit(masked=False)
    else:
        is_last = pl.program_id(0) == pl.num_programs(0) - 1

        @pl.when(jnp.logical_not(is_last))
        def _():
            emit(masked=False)

        @pl.when(is_last)
        def _():
            emit(masked=True)


def _pick_tile_rows(itemsize):
    """Per-input block byte budget per generation (scoped-VMEM safe):
    v5e (16 MiB default scoped VMEM) -> 2 MiB; v6e/v7x (32 MiB) -> 4 MiB.
    With double buffering: 2 inputs x 2 bufs x budget = 8 / 16 MiB."""
    kind = ""
    try:
        kind = jax.devices()[0].device_kind.lower()
    except Exception:  # pragma: no cover - defensive
        pass
    budget = (2 << 20) if "v5" in kind else (4 << 20)
    return max(8, budget // (LANES * itemsize))


def mse_loss(x, t, weight=1.0, tile_rows=None):
    assert x.shape == t.shape, (x.shape, t.shape)
    n_elems = x.size

    xf = jnp.ravel(x)
    tf = jnp.ravel(t)

    itemsize = jnp.dtype(x.dtype).itemsize
    if tile_rows is None:
        tile_rows = _pick_tile_rows(itemsize)

    # Lane tail (< 128 elements): handled with plain jnp instead of jnp.pad,
    # so the common multiple-of-128 case never copies the inputs.
    main = (n_elems // LANES) * LANES
    if main != n_elems:
        dt = xf[main:].astype(jnp.float32) - tf[main:].astype(jnp.float32)
        tail_sum = jnp.sum(dt * dt)
        xf = xf[:main]
        tf = tf[:main]
    else:
        tail_sum = jnp.float32(0.0)

    if main == 0:
        total = tail_sum
    else:
        rows = main // LANES
        x2 = xf.reshape(rows, LANES)
        t2 = tf.reshape(rows, LANES)

        # Block sizing: as big as the per-generation budget allows (amortize
        # per-step overhead), but keep >= MIN_BLOCKS grid steps so the
        # "parallel" axis can shard across both v7x TensorCores.
        MIN_BLOCKS = 4
        block_rows = min(int(tile_rows), rows,
                         max(8, pl.cdiv(rows, MIN_BLOCKS)))
        if block_rows < rows:
            block_rows = max(8, (block_rows // 8) * 8)
        num_blocks = pl.cdiv(rows, block_rows)
        last_block_rows = rows - (num_blocks - 1) * block_rows
        if last_block_rows == block_rows:
            last_block_rows = 0  # static flag: no masking needed anywhere

        out_sub = 8 if block_rows % 8 == 0 else 1

        kernel = functools.partial(
            _mse_partial_kernel, last_block_rows=last_block_rows)

        cost = pl.CostEstimate(
            flops=3 * main,
            transcendentals=0,
            bytes_accessed=2 * main * itemsize + 4 * num_blocks * out_sub * LANES,
        )

        partials = pl.pallas_call(
            kernel,
            out_shape=jax.ShapeDtypeStruct((num_blocks, out_sub, LANES),
                                           jnp.float32),
            grid_spec=pltpu.PrefetchScalarGridSpec(
                num_scalar_prefetch=0,
                grid=(num_blocks,),
                in_specs=[
                    pl.BlockSpec((block_rows, LANES), lambda i: (i, 0)),
                    pl.BlockSpec((block_rows, LANES), lambda i: (i, 0)),
                ],
                out_specs=pl.BlockSpec((1, out_sub, LANES),
                                       lambda i: (i, 0, 0)),
            ),
            compiler_params=pltpu.CompilerParams(
                dimension_semantics=("parallel",)),
            cost_estimate=cost,
        )(x2, t2)

        total = jnp.sum(partials) + tail_sum

    # Fold scalar weight and the mean divisor in the wrapper.
    return total * (jnp.float32(weight) / jnp.float32(n_elems))


if __name__ == "__main__":
    key = jax.random.PRNGKey(0)
    k1, k2 = jax.random.split(key)

    weight = 1.0  # matches MSELoss(weight=1)

    # Primary case: NCHW-like small shape (multiple of 128 -> no-mask fast path).
    x = jax.random.normal(k1, (2, 4, 16, 16), dtype=jnp.float32)
    t = jax.random.normal(k2, (2, 4, 16, 16), dtype=jnp.float32)
    loss = mse_loss(x, t, weight=weight)
    jax.block_until_ready(loss)
    ref = jnp.mean(weight * (x - t) ** 2)
    assert jnp.allclose(loss, ref, rtol=1e-5, atol=1e-6), (loss, ref)

    # Ragged-rows case: exercises the masked last-block branch.
    xr = jax.random.normal(k1, (2, 4, 17, 16), dtype=jnp.float32)
    tr = jax.random.normal(k2, (2, 4, 17, 16), dtype=jnp.float32)
    loss_r = mse_loss(xr, tr, weight=weight)
    jax.block_until_ready(loss_r)
    ref_r = jnp.mean(weight * (xr - tr) ** 2)
    assert jnp.allclose(loss_r, ref_r, rtol=1e-5, atol=1e-6), (loss_r, ref_r)

    # Non-multiple-of-128 element count: exercises the jnp lane-tail path.
    xs = jax.random.normal(k1, (7, 19), dtype=jnp.float32)
    ts = jax.random.normal(k2, (7, 19), dtype=jnp.float32)
    loss_s = mse_loss(xs, ts, weight=weight)
    jax.block_until_ready(loss_s)
    ref_s = jnp.mean(weight * (xs - ts) ** 2)
    assert jnp.allclose(loss_s, ref_s, rtol=1e-5, atol=1e-6), (loss_s, ref_s)

    print("KERNEL_OK")
</pallas_src>

<mosaic_0001>
module attributes {stable_mosaic.version = 11 : i64} {
  func.func @_mse_partial_kernel(%arg0: i32, %arg1: memref<8x128xf32, #tpu.memory_space<vmem>>, %arg2: memref<8x128xf32, #tpu.memory_space<vmem>>, %arg3: memref<1x8x128xf32, #tpu.memory_space<vmem>>) attributes {dimension_semantics = [#tpu.dimension_semantics<parallel>], iteration_bounds = array<i64: 2>, scalar_prefetch = 0 : i64, scratch_operands = 0 : i64, tpu.core_type = #tpu.core_type<tc>, window_params = [{transform_indices = @transform_0, window_bounds = array<i64: 8, 128>}, {transform_indices = @transform_1, window_bounds = array<i64: 8, 128>}, {transform_indices = @transform_2, window_bounds = array<i64: 1, 8, 128>}]} {
    %c0 = arith.constant 0 : index
    %c0_0 = arith.constant 0 : index
    %0 = vector.load %arg1[%c0, %c0_0] : memref<8x128xf32, #tpu.memory_space<vmem>>, vector<8x128xf32>
    %c0_1 = arith.constant 0 : index
    %c0_2 = arith.constant 0 : index
    %1 = vector.load %arg2[%c0_1, %c0_2] : memref<8x128xf32, #tpu.memory_space<vmem>>, vector<8x128xf32>
    %2 = arith.subf %0, %1 : vector<8x128xf32>
    %3 = arith.mulf %2, %2 : vector<8x128xf32>
    %4 = vector.shape_cast %3 : vector<8x128xf32> to vector<1x8x128xf32>
    %cst = arith.constant dense<0.000000e+00> : vector<8x128xf32>
    %5 = vector.multi_reduction <add>, %4, %cst [0] : vector<1x8x128xf32> to vector<8x128xf32>
    %6 = vector.shape_cast %5 : vector<8x128xf32> to vector<1x8x128xf32>
    %c0_3 = arith.constant 0 : index
    %c0_4 = arith.constant 0 : index
    %c0_5 = arith.constant 0 : index
    %7 = vector.load %arg3[%c0_3, %c0_4, %c0_5] : memref<1x8x128xf32, #tpu.memory_space<vmem>>, vector<1x8x128xf32>
    tpu.vector_store %arg3[%c0_3, %c0_4, %c0_5], %6 {strides = array<i32>} : memref<1x8x128xf32, #tpu.memory_space<vmem>>, vector<1x8x128xf32>,
    return
  }
  func.func @transform_0(%arg0: i32) -> (i32, i32) {
    %c0_i32 = arith.constant 0 : i32
    %c0_i32_0 = arith.constant 0 : i32
    return %arg0, %c0_i32 : i32, i32
  }
  func.func @transform_1(%arg0: i32) -> (i32, i32) {
    %c0_i32 = arith.constant 0 : i32
    %c0_i32_0 = arith.constant 0 : i32
    return %arg0, %c0_i32 : i32, i32
  }
  func.func @transform_2(%arg0: i32) -> (i32, i32, i32) {
    %c0_i32 = arith.constant 0 : i32
    %c0_i32_0 = arith.constant 0 : i32
    %c0_i32_1 = arith.constant 0 : i32
    return %arg0, %c0_i32, %c0_i32_0 : i32, i32, i32
  }
}

</mosaic_0001>

<bundles_post_ra>
// kernel: tpu_custom_call.1
= control target key start
LH: loop header
LB: loop body
LE: loop exit
PB: predicated region body
PF: predicated region fallthrough
CT: control target
= control target key end

     0   :  { %7 = vsyncpa [#allocation3], 0  ;;  %s688_s0 = inlined_call_operand.hbm [shape: f32[16,128], index: 0, kind: input, shape index: {}]   ;;  %s689_s1 = inlined_call_operand.hbm [shape: f32[16,128], index: 1, kind: input, shape index: {}]   ;;  %s690_s2 = inlined_call_operand.hbm [shape: f32[2,8,128], index: 2, kind: output, shape index: {}]  }
   0x1   :  { %9 = vsyncpa [#allocation3 + $0x1], 0 }
   0x2   :  { %10 = vsyncpa [#allocation6], 0 }
   0x3   :  { %12 = vsyncpa [#allocation6 + $0x1], 0 }
   0x4   :  { %13 = vsyncpa [#allocation4], 0 }
   0x5   :  { %15 = vsyncpa [#allocation4 + $0x1], 0  ;;  %s528_s9 = smov 0   ;;  %s530_s10 = smov 0  }
   0x6   :  { %s532_s11 = smov 0   ;;  %s534_s12 = smov 0  }
   0x7 LB: > { %s549_s13 = sadd.s32 4294967295, %s511_s12   ;;  %s315_s14 = sadd.s32 4294967294, %s511_s12   ;;  %s511_s12 = sphi %s534_s12, %s701_s12   ;;  %s507_s11 = sphi %s532_s11, %s700_s11   ;;  %s503_s10 = sphi %s530_s10, %s699_s10   ;;  %s499_s9 = sphi %s528_s9, %s698_s9  }
   0x8   : > { %s553_s15 = sadd.s32 1, %s511_s12   ;;  %s28_s16 = sadd.s32 1, %s507_s11 }
   0x9   : > { %s25_s17 = ssub.s32 %s511_s12, %s553_s15  ;;  %p35_p0 = scmp.ne.s32.totalorder %s507_s11, %s503_s10 }
   0xa   : > { %p26_p1 = scmp.eq.s32.totalorder %s25_s17, 0  ;;  %p36_p2 = scmp.eq.s32.totalorder %s511_s12, 0 }
   0xb   : > { %p41_p3 = scmp.ne.s32.totalorder %s503_s10, %s499_s9  ;;  %p42_p4 = scmp.eq.s32.totalorder %s549_s13, 0 }
   0xc   : > { %s565_s18 = scalar_select %p26_p1, %s507_s11, %s28_s16  }
   0xd   : > { %p567_p5 = por %p36_p2, %p35_p0  ;;  %p571_p6 = por %p42_p4, %p41_p3 }
   0xe   : > { %p91_p7 = scmp.eq.s32.totalorder %s549_s13, 1  ;;  %p97_p8 = scmp.eq.s32.totalorder %s315_s14, 1 }
   0xf   : > { %p347_p10 = scmp.lt.s32.totalorder %s511_s12, 2  ;;  %s587_s23 = sand.u32 1, %s507_s11  }
  0x10   : > { %p578_p11 = por %p91_p7, %p35_p0  ;;  %p582_p12 = por %p97_p8, %p41_p3 }
  0x11   : > { %s319_s24 = sshll.u32 %s511_s12, 3  ;;  %s318_s25 = sshll.u32 %s587_s23, 3 }
  0x12   : > { %s125_s28 = scalar_lea.hbm %s688_s0, %s319_s24  ;;  %s121_s30 = scalar_lea.vmem [#allocation2], %s318_s25 }
  0x13   : > { %s127_s29 = sshll.u32 %s125_s28, 4  ;;  %s129_s3 = sshll.u32 %s121_s30, 4  ;;  %s128_s29 = int_to_ptr.hbm [resolvable:$true] %s127_s29  ;;  %s130_s3 = int_to_ptr.vmem [resolvable:$true] %s129_s3 }
  0x14   : > { %p596_p13 = pnand %p347_p10, %p567_p5  ;;  %p322_p0 = scmp.ge.s32.totalorder %s511_s12, 1 }
  0x15   : > { %p153_p1 = scmp.lt.s32.totalorder %s511_s12, 3  ;;  %s118_s5 = scalar_lea.sflag [#allocation3], %s587_s23 }
  0x16   : > { %s381_s6 = sshra.s32 %s128_s29, 4  ;;  %p385_p3 = pneg %p596_p13  ;;  %s382_s6 = int_to_ptr.hbm [resolvable:$true] %s381_s6 }
  0x17   : > { %s383_s7 = scalar_lea.hbm %s382_s6, 8  ;;  %s388_s16 = scalar_lea.hbm %s688_s0, 16 }
  0x18   : > { %p384_p2 = scmp.ne.s32.totalorder %s382_s6, %s383_s7  ;;  %p389_p5 = scmp.lt.s32.totalorder %s382_s6, %s688_s0 }
  0x19   : > { %p390_p8 = scmp.lt.s32.totalorder %s388_s16, %s383_s7 }
  0x1a   : > { %p386_p4 = pnand %p385_p3, %p384_p2 }
  0x1b   : > { %p391_p10 = por %p390_p8, %p389_p5 }
  0x1c   : > { %p387_p7 = pneg %p386_p4 }
  0x1e   : > { %p392_p9 = pnand %p391_p10, %p387_p7 }
  0x20   : > { %395 = shalt.err (!%p392_p9)
}
  0x21   : > { %339 = dma.hbm_to_vmem [thread:$0]  (!%p596_p13), %s128_s29, 128, %s130_s3, %s118_s5  }
  0x22   : > { %p620_p2 = pnand %p322_p0, %p153_p1  ;;  %s144_s30 = scalar_lea.hbm %s689_s1, %s319_s24 }
  0x23   : > { %s146_s6 = sshll.u32 %s144_s30, 4  ;;  %s140_s7 = scalar_lea.vmem [#allocation5], %s318_s25  ;;  %s147_s6 = int_to_ptr.hbm [resolvable:$true] %s146_s6 }
  0x24   : > { %s148_s8 = sshll.u32 %s140_s7, 4  ;;  %s137_s14 = scalar_lea.sflag [#allocation6], %s587_s23  ;;  %s149_s8 = int_to_ptr.vmem [resolvable:$true] %s148_s8 }
  0x25   : > { %s411_s16 = sshra.s32 %s147_s6, 4  ;;  %s418_s5 = scalar_lea.hbm %s689_s1, 16  ;;  %s412_s16 = int_to_ptr.hbm [resolvable:$true] %s411_s16 }
  0x26   : > { %s413_s17 = scalar_lea.hbm %s412_s16, 8  ;;  %p419_p4 = scmp.lt.s32.totalorder %s412_s16, %s689_s1 }
  0x27   : > { %p414_p9 = scmp.ne.s32.totalorder %s412_s16, %s413_s17  ;;  %p420_p7 = scmp.lt.s32.totalorder %s418_s5, %s413_s17 }
  0x29   : > { %p416_p0 = pnand %p414_p9, %p385_p3  ;;  %p421_p5 = por %p420_p7, %p419_p4 }
  0x2b   : > { %p417_p1 = pneg %p416_p0 }
  0x2d   : > { %p422_p8 = pnand %p421_p5, %p417_p1 }
  0x2f   : > { %425 = shalt.err (!%p422_p8)
}
  0x30   : > { %342 = dma.hbm_to_vmem [thread:$0]  (!%p596_p13), %s147_s6, 128, %s149_s8, %s137_s14  }
  0x31   : > { %157 = sbr.rel (%p620_p2) target bundleno = 72 (0x48), region = 28  ;;  %s642_s23 = sand.u32 (!%p620_p2), 1, %s503_s10  }
  0x32   : > { %s323_s25 = sshll.u32 (!%p620_p2), %s642_s23, 3  ;;  %s160_s27 = scalar_lea.sflag (!%p620_p2), [#allocation3], %s642_s23 }
  0x33   : > { %s163_s28 = scalar_lea.vmem (!%p620_p2), [#allocation2], %s323_s25 }
  0x36   : > { %486 = dma.done.wait (%p571_p6), %s160_s27, 128  }
  0x37   : > { %488 = vsyncadd (%p571_p6), %s160_s27, 4294967168  ;;  %s170_s4 = scalar_lea.sflag [#allocation6], %s642_s23  ;;  %s173_s30 = scalar_lea.vmem [#allocation5], %s323_s25 }
  0x38   : > { %490 = dma.done.wait (%p571_p6), %s170_s4, 128  }
  0x39   : > { %492 = vsyncadd (%p571_p6), %s170_s4, 4294967168  ;;  %s327_s26 = sshll.u32 %s549_s13, 3  ;;  %v200_v0 = vld [vmem:[%s163_s28] sm:$0xff]  ;;  %v201_v1 = vld [vmem:[%s173_s30] sm:$0xff]  ;;  %s199_s14 = scalar_lea.vmem [#allocation7], %s323_s25 }
  0x3a   : > { %s217_s8 = scalar_lea.hbm %s690_s2, %s327_s26  ;;  %s219_s16 = sshll.u32 %s199_s14, 4  ;;  %v202_v2 = vsub.f32 %v200_v0, %v201_v1  ;;  %s220_s16 = int_to_ptr.vmem [resolvable:$true] %s219_s16 }
  0x3b   : > { %s221_s17 = sshll.u32 %s217_s8, 4  ;;  %s207_s20 = scalar_lea.sflag [#allocation4], %s642_s23  ;;  %s222_s17 = int_to_ptr.hbm [resolvable:$true] %s221_s17 }
  0x3c   : > { %v203_v3 = vmul.f32 %v202_v2, %v202_v2  ;;  %s455_s29 = sshra.s32 %s222_s17, 4  ;;  %s461_s19 = scalar_lea.hbm %s690_s2, 16  ;;  %s456_s29 = int_to_ptr.hbm [resolvable:$true] %s455_s29 }
  0x3d   : > { %s457_s3 = scalar_lea.hbm %s456_s29, 8  ;;  %p462_p10 = scmp.lt.s32.totalorder %s456_s29, %s690_s2 }
  0x3e   : > { %205 = vst [vmem:[%s199_s14] sm:$0xff] %v203_v3  ;;  %p458_p6 = scmp.ne.s32.totalorder %s456_s29, %s457_s3  ;;  %p463_p2 = scmp.lt.s32.totalorder %s461_s19, %s457_s3 }
  0x40   : > { %p459_p13 = pnand %p458_p6, %p578_p11  ;;  %p464_p9 = por %p463_p2, %p462_p10 }
  0x42   : > { %p460_p3 = pneg %p459_p13 }
  0x44   : > { %p465_p0 = pnand %p464_p9, %p460_p3 }
  0x46   : > { %468 = shalt.err (!%p465_p0)
}
  0x47   : > { %334 = dma.vmem_to_hbm [thread:$0]  (%p578_p11), %s220_s16, 128, %s222_s17, %s207_s20  }
  0x48 PF: > { %s233_s23 = sand.u32 1, %s499_s9   ;;  %p697_p1 = scmp.ge.s32.totalorder %s511_s12, 2 }
  0x49   : > { %s234_s27 = scalar_lea.sflag [#allocation4], %s233_s23 }
  0x4a   : > { %p344_p4 = pnand %p697_p1, %p582_p12 }
  0x4c   : > { %p345_p7 = pneg %p344_p4 }
  0x4e   : > { %494 = dma.done.wait (%p345_p7), %s234_s27, 128  }
  0x4f   : > { %496 = vsyncadd (%p345_p7), %s234_s27, 4294967168  ;;  %p18_p5 = scmp.ge.s32.totalorder %s553_s15, 4   ;;  %s698_s9 = smov %s503_s10 }
  0x50   : > { %s699_s10 = smov %s507_s11  ;;  %s700_s11 = smov %s565_s18 }
  0x51   : > { %s701_s12 = smov %s553_s15  ;;  %20 = sbr.rel (!%p18_p5) target bundleno = 7 (0x7), region = 86 }
  0x56   :  { %240 = vsyncpa [#allocation3], 1 }
  0x57   :  { %242 = vsyncpa [#allocation3 + $0x1], 1 }
  0x58   :  { %243 = vsyncpa [#allocation6], 1 }
  0x59   :  { %245 = vsyncpa [#allocation6 + $0x1], 1 }
  0x5a   :  { %246 = vsyncpa [#allocation4], 1 }
  0x5b   :  { %248 = vsyncpa [#allocation4 + $0x1], 1 }

</bundles_post_ra>
